<compile_context>
chip_gen: v6e
topology: v6e:2x2x1
jax: 0.10.0
libtpu: 0.0.40
codegen_flags: <defaults>
</compile_context>

<pallas_src>
import functools

import jax
import jax.numpy as jnp
from jax.experimental import pallas as pl
from jax.experimental.pallas import tpu as pltpu


def _round_up(n, m):
    return (n + m - 1) // m * m


def _pick_time_chunk(t, bp, hp):
    """Largest sublane-friendly time chunk whose per-chunk hidden-state buffer
    stays within ~16 vregs of f32 (bp * ts * hp <= 16 * 1024 elements)."""
    max_ts = max(8, (16 * 1024) // max(bp * hp // 128, 1) // 128 * 128 // 128)
    # Simpler, explicit cap: bp*ts*hp <= 16384 f32 elements.
    max_ts = max(8, 16384 // max(bp * hp, 1))
    for cand in (32, 16, 8):
        if cand <= max_ts and t >= cand and t % cand == 0:
            return cand
    return t


def _vmem_estimate_bytes(ts, bp, v, hp, vp):
    f32 = 4
    io_blocks = 2 * (ts * bp * v + ts * bp * vp) * f32          # double-buffered in/out
    weights = 2 * (v * hp + hp * hp + hp + hp * vp + vp) * f32  # loop-invariant blocks
    scratch = (bp * hp + ts * bp * hp) * f32                    # h carry + hs chunk
    return io_blocks + weights + scratch


# -----------------------------------------------------------------------------
# Fused kernel: per time-chunk
#   pre   = x_chunk @ Wih^T + (b_ih + b_hh)           (batched MXU matmul)
#   h_t   = tanh(pre_t + h_{t-1} @ Whh^T)             (serial, 1 matmul/step)
#   out   = hs_chunk @ Wout^T + b_out                 (batched MXU matmul)
# h is carried across chunks in a VMEM scratch.
# -----------------------------------------------------------------------------
def _fused_vrnn_kernel(x_ref, wih_ref, whh_ref, bh_ref, wout_ref, bout_ref,
                       o_ref, h_ref, hs_ref, *, ts):
    # x_ref   : (TS, Bp, V)   time-major chunk of the zero-padded input
    # wih_ref : (V, Hp)       W_ih^T  (hidden dim zero-padded to 128 lanes)
    # whh_ref : (Hp, Hp)      W_hh^T
    # bh_ref  : (1, Hp)       b_ih + b_hh
    # wout_ref: (Hp, Vp)      W_out^T (output dim zero-padded to 128 lanes)
    # bout_ref: (1, Vp)       b_out
    # o_ref   : (TS, Bp, Vp)  logits chunk (lane-dense stores)
    # h_ref   : (Bp, Hp)      hidden-state carry across chunks (VMEM scratch)
    # hs_ref  : (TS, Bp, Hp)  per-chunk hidden states (VMEM scratch)
    @pl.when(pl.program_id(0) == 0)
    def _():
        h_ref[...] = jnp.zeros_like(h_ref)

    # Chunk prologue: batched input projection (off the serial critical path).
    pre = jnp.einsum("tbv,vh->tbh", x_ref[...], wih_ref[...],
                     preferred_element_type=jnp.float32) + bh_ref[...]

    # Serial recurrence: one (Bp,Hp)x(Hp,Hp) MXU matmul + tanh per step.
    whh = whh_ref[...]
    h = h_ref[...]
    for s in range(ts):  # static unroll over the chunk (LLO visibility)
        h = jnp.tanh(pre[s] + jnp.dot(h, whh,
                                      preferred_element_type=jnp.float32))
        hs_ref[s] = h     # full (8,128)-tile store, unmasked
    h_ref[...] = h

    # Chunk epilogue: batched output projection, single lane-dense store.
    o_ref[...] = (jnp.einsum("tbh,hv->tbv", hs_ref[...], wout_ref[...],
                             preferred_element_type=jnp.float32)
                  + bout_ref[...]).astype(o_ref.dtype)


def vrnn_forward(x, w_ih, w_hh, b_ih, b_hh, w_out, b_out):
    """x: (B, T, V) float32. Matches torch.nn.RNN(batch_first=True, tanh)
    followed by nn.Linear; returns logits (B, T, V)."""
    B, T, V = x.shape
    H = w_hh.shape[0]
    Hp = _round_up(H, 128)   # lane-align hidden dim (zero padding is exact)
    Vp = _round_up(V, 128)   # lane-align logits dim (zero padding is exact)
    Bp = _round_up(B, 8)     # sublane-align batch (padded rows are discarded)

    wih_t = jnp.pad(w_ih.T, ((0, 0), (0, Hp - H)))              # (V, Hp)
    whh_t = jnp.pad(w_hh.T, ((0, Hp - H), (0, Hp - H)))         # (Hp, Hp)
    bh = jnp.pad(b_ih + b_hh, (0, Hp - H)).reshape(1, Hp)       # (1, Hp)
    wout_t = jnp.pad(w_out.T, ((0, Hp - H), (0, Vp - V)))       # (Hp, Vp)
    bout = jnp.pad(b_out, (0, Vp - V)).reshape(1, Vp)           # (1, Vp)

    # Time-major, batch-padded input so every per-step access inside the
    # kernel is a full (8,128) tile.  (Tiny one-off layout op in the wrapper.)
    x_tm = jnp.pad(x, ((0, Bp - B), (0, 0), (0, 0))).transpose(1, 0, 2)  # (T,Bp,V)

    ts = _pick_time_chunk(T, Bp, Hp)
    vmem_bytes = _vmem_estimate_bytes(ts, Bp, V, Hp, Vp)
    vmem_limit = int(min(max(2 * vmem_bytes, 16 * 2**20), 64 * 2**20))

    logits_tm = pl.pallas_call(
        functools.partial(_fused_vrnn_kernel, ts=ts),
        out_shape=jax.ShapeDtypeStruct((T, Bp, Vp), jnp.float32),
        grid_spec=pltpu.PrefetchScalarGridSpec(
            num_scalar_prefetch=0,
            grid=(T // ts,),
            in_specs=[
                pl.BlockSpec((ts, Bp, V), lambda c: (c, 0, 0)),   # x chunk
                pl.BlockSpec((V, Hp), lambda c: (0, 0)),          # Wih^T
                pl.BlockSpec((Hp, Hp), lambda c: (0, 0)),         # Whh^T
                pl.BlockSpec((1, Hp), lambda c: (0, 0)),          # b_ih + b_hh
                pl.BlockSpec((Hp, Vp), lambda c: (0, 0)),         # Wout^T
                pl.BlockSpec((1, Vp), lambda c: (0, 0)),          # b_out
            ],
            out_specs=pl.BlockSpec((ts, Bp, Vp), lambda c: (c, 0, 0)),
            scratch_shapes=[
                pltpu.VMEM((Bp, Hp), jnp.float32),      # h carry across chunks
                pltpu.VMEM((ts, Bp, Hp), jnp.float32),  # hs for this chunk
            ],
        ),
        compiler_params=pltpu.CompilerParams(
            dimension_semantics=("arbitrary",),  # sequential: h carried over T
            vmem_limit_bytes=vmem_limit,
        ),
    )(x_tm, wih_t, whh_t, bh, wout_t, bout)

    # Drop batch / vocab padding, back to (B, T, V).
    return logits_tm[:, :B, :V].transpose(1, 0, 2)


def vrnn_reference(x, w_ih, w_hh, b_ih, b_hh, w_out, b_out):
    """Pure-JAX reference matching torch.nn.RNN(batch_first=True) + Linear."""
    B, T, V = x.shape
    H = w_hh.shape[0]

    def step(h, x_t):
        h_new = jnp.tanh(x_t @ w_ih.T + b_ih + h @ w_hh.T + b_hh)
        return h_new, h_new

    h0 = jnp.zeros((B, H), jnp.float32)
    _, hs = jax.lax.scan(step, h0, jnp.transpose(x, (1, 0, 2)))  # (T, B, H)
    out = jnp.transpose(hs, (1, 0, 2))                           # (B, T, H)
    return out @ w_out.T + b_out


if __name__ == "__main__":
    # Small shapes consistent with the module (hidden_size=128, small vocab).
    B, T, V, H = 2, 8, 16, 128

    key = jax.random.PRNGKey(0)
    ks = jax.random.split(key, 7)
    s_rnn = 1.0 / jnp.sqrt(H)
    w_ih = jax.random.uniform(ks[0], (H, V), jnp.float32, -s_rnn, s_rnn)
    w_hh = jax.random.uniform(ks[1], (H, H), jnp.float32, -s_rnn, s_rnn)
    b_ih = jax.random.uniform(ks[2], (H,), jnp.float32, -s_rnn, s_rnn)
    b_hh = jax.random.uniform(ks[3], (H,), jnp.float32, -s_rnn, s_rnn)
    w_out = jax.random.uniform(ks[4], (V, H), jnp.float32, -s_rnn, s_rnn)
    b_out = jax.random.uniform(ks[5], (V,), jnp.float32, -s_rnn, s_rnn)

    x = jax.random.normal(ks[6], (B, T, V), jnp.float32)

    out = vrnn_forward(x, w_ih, w_hh, b_ih, b_hh, w_out, b_out)
    out = jax.block_until_ready(out)

    ref = vrnn_reference(x, w_ih, w_hh, b_ih, b_hh, w_out, b_out)
    assert out.shape == (B, T, V)
    assert jnp.allclose(out, ref, atol=1e-4, rtol=1e-4), \
        f"max err {jnp.max(jnp.abs(out - ref))}"

    print("KERNEL_OK")
</pallas_src>

<mosaic_0001>
module attributes {stable_mosaic.version = 11 : i64} {
  func.func @_fused_vrnn_kernel(%arg0: i32, %arg1: memref<8x8x16xf32, #tpu.memory_space<vmem>>, %arg2: memref<16x128xf32, #tpu.memory_space<vmem>>, %arg3: memref<128x128xf32, #tpu.memory_space<vmem>>, %arg4: memref<1x128xf32, #tpu.memory_space<vmem>>, %arg5: memref<128x128xf32, #tpu.memory_space<vmem>>, %arg6: memref<1x128xf32, #tpu.memory_space<vmem>>, %arg7: memref<8x8x128xf32, #tpu.memory_space<vmem>>, %arg8: memref<8x128xf32, #tpu.memory_space<vmem>>, %arg9: memref<8x8x128xf32, #tpu.memory_space<vmem>>) attributes {dimension_semantics = [#tpu.dimension_semantics<arbitrary>], iteration_bounds = array<i64: 1>, scalar_prefetch = 0 : i64, scratch_operands = 2 : i64, tpu.core_type = #tpu.core_type<tc>, window_params = [{transform_indices = @transform_0, window_bounds = array<i64: 8, 8, 16>}, {pipeline_mode = #tpu.pipeline_mode<synchronous>, transform_indices = @transform_1, window_bounds = array<i64: 16, 128>}, {pipeline_mode = #tpu.pipeline_mode<synchronous>, transform_indices = @transform_2, window_bounds = array<i64: 128, 128>}, {pipeline_mode = #tpu.pipeline_mode<synchronous>, transform_indices = @transform_3, window_bounds = array<i64: 1, 128>}, {pipeline_mode = #tpu.pipeline_mode<synchronous>, transform_indices = @transform_4, window_bounds = array<i64: 128, 128>}, {pipeline_mode = #tpu.pipeline_mode<synchronous>, transform_indices = @transform_5, window_bounds = array<i64: 1, 128>}, {transform_indices = @transform_6, window_bounds = array<i64: 8, 8, 128>}]} {
    %c0_i32 = arith.constant 0 : i32
    %0 = arith.cmpi eq, %arg0, %c0_i32 : i32
    %1 = arith.extui %0 : i1 to i32
    %c0_i32_0 = arith.constant 0 : i32
    %2 = arith.cmpi ne, %1, %c0_i32_0 : i32
    scf.if %2 {
      %cst_49 = arith.constant 0.000000e+00 : f32
      %85 = vector.broadcast %cst_49 : f32 to vector<8x128xf32>
      %c0_50 = arith.constant 0 : index
      %c0_51 = arith.constant 0 : index
      %86 = vector.load %arg8[%c0_50, %c0_51] : memref<8x128xf32, #tpu.memory_space<vmem>>, vector<8x128xf32>
      tpu.vector_store %arg8[%c0_50, %c0_51], %85 {strides = array<i32>} : memref<8x128xf32, #tpu.memory_space<vmem>>, vector<8x128xf32>,
    } else {
    }
    %c0 = arith.constant 0 : index
    %c0_1 = arith.constant 0 : index
    %c0_2 = arith.constant 0 : index
    %3 = vector.load %arg1[%c0, %c0_1, %c0_2] : memref<8x8x16xf32, #tpu.memory_space<vmem>>, vector<8x8x16xf32>
    %c0_3 = arith.constant 0 : index
    %c0_4 = arith.constant 0 : index
    %4 = vector.load %arg2[%c0_3, %c0_4] : memref<16x128xf32, #tpu.memory_space<vmem>>, vector<16x128xf32>
    "tpu.trace_start"() <{level = 10 : i32, message = "tbv,vh->tbh"}> : () -> ()
    %cst = arith.constant dense<0.000000e+00> : vector<8x8x128xf32>
    %5 = tpu.matmul %3, %4, %cst {dimension_numbers = #tpu.dot_dimension_numbers<[2], [0], [0, 1], [1], [0, 0, 0, 1, 1, 1], [], []>} : vector<8x8x16xf32>, vector<16x128xf32>, vector<8x8x128xf32> -> vector<8x8x128xf32>
    "tpu.trace_stop"() : () -> ()
    %c0_5 = arith.constant 0 : index
    %c0_6 = arith.constant 0 : index
    %6 = vector.load %arg4[%c0_5, %c0_6] : memref<1x128xf32, #tpu.memory_space<vmem>>, vector<1x128xf32>
    %7 = vector.shape_cast %6 : vector<1x128xf32> to vector<1x1x128xf32>
    %8 = vector.broadcast %7 : vector<1x1x128xf32> to vector<8x8x128xf32>
    %9 = arith.addf %5, %8 : vector<8x8x128xf32>
    %c0_7 = arith.constant 0 : index
    %c0_8 = arith.constant 0 : index
    %10 = vector.load %arg3[%c0_7, %c0_8] : memref<128x128xf32, #tpu.memory_space<vmem>>, vector<128x128xf32>
    %c0_9 = arith.constant 0 : index
    %c0_10 = arith.constant 0 : index
    %11 = vector.load %arg8[%c0_9, %c0_10] : memref<8x128xf32, #tpu.memory_space<vmem>>, vector<8x128xf32>
    %12 = vector.extract_strided_slice %9 {offsets = [0, 0, 0], sizes = [1, 8, 128], strides = [1, 1, 1]} : vector<8x8x128xf32> to vector<1x8x128xf32>
    %13 = vector.shape_cast %12 : vector<1x8x128xf32> to vector<8x128xf32>
    %cst_11 = arith.constant dense<0.000000e+00> : vector<8x128xf32>
    %14 = tpu.matmul %11, %10, %cst_11 {dimension_numbers = #tpu.dot_dimension_numbers<[1], [0], [0], [1], [0, 0, 1, 1], [], []>} : vector<8x128xf32>, vector<128x128xf32>, vector<8x128xf32> -> vector<8x128xf32>
    %15 = arith.addf %13, %14 : vector<8x128xf32>
    %16 = math.tanh %15 : vector<8x128xf32>
    %c0_12 = arith.constant 0 : index
    %c0_13 = arith.constant 0 : index
    %c0_14 = arith.constant 0 : index
    %17 = vector.load %arg9[%c0_12, %c0_13, %c0_14] : memref<8x8x128xf32, #tpu.memory_space<vmem>>, vector<1x8x128xf32>
    %18 = vector.shape_cast %17 : vector<1x8x128xf32> to vector<8x128xf32>
    %19 = vector.shape_cast %16 : vector<8x128xf32> to vector<1x8x128xf32>
    tpu.vector_store %arg9[%c0_12, %c0_13, %c0_14], %19 {strides = array<i32>} : memref<8x8x128xf32, #tpu.memory_space<vmem>>, vector<1x8x128xf32>,
    %20 = vector.extract_strided_slice %9 {offsets = [1, 0, 0], sizes = [1, 8, 128], strides = [1, 1, 1]} : vector<8x8x128xf32> to vector<1x8x128xf32>
    %21 = vector.shape_cast %20 : vector<1x8x128xf32> to vector<8x128xf32>
    %cst_15 = arith.constant dense<0.000000e+00> : vector<8x128xf32>
    %22 = tpu.matmul %16, %10, %cst_15 {dimension_numbers = #tpu.dot_dimension_numbers<[1], [0], [0], [1], [0, 0, 1, 1], [], []>} : vector<8x128xf32>, vector<128x128xf32>, vector<8x128xf32> -> vector<8x128xf32>
    %23 = arith.addf %21, %22 : vector<8x128xf32>
    %24 = math.tanh %23 : vector<8x128xf32>
    %c1 = arith.constant 1 : index
    %c0_16 = arith.constant 0 : index
    %c0_17 = arith.constant 0 : index
    %25 = vector.load %arg9[%c1, %c0_16, %c0_17] : memref<8x8x128xf32, #tpu.memory_space<vmem>>, vector<1x8x128xf32>
    %26 = vector.shape_cast %25 : vector<1x8x128xf32> to vector<8x128xf32>
    %27 = vector.shape_cast %24 : vector<8x128xf32> to vector<1x8x128xf32>
    tpu.vector_store %arg9[%c1, %c0_16, %c0_17], %27 {strides = array<i32>} : memref<8x8x128xf32, #tpu.memory_space<vmem>>, vector<1x8x128xf32>,
    %28 = vector.extract_strided_slice %9 {offsets = [2, 0, 0], sizes = [1, 8, 128], strides = [1, 1, 1]} : vector<8x8x128xf32> to vector<1x8x128xf32>
    %29 = vector.shape_cast %28 : vector<1x8x128xf32> to vector<8x128xf32>
    %cst_18 = arith.constant dense<0.000000e+00> : vector<8x128xf32>
    %30 = tpu.matmul %24, %10, %cst_18 {dimension_numbers = #tpu.dot_dimension_numbers<[1], [0], [0], [1], [0, 0, 1, 1], [], []>} : vector<8x128xf32>, vector<128x128xf32>, vector<8x128xf32> -> vector<8x128xf32>
    %31 = arith.addf %29, %30 : vector<8x128xf32>
    %32 = math.tanh %31 : vector<8x128xf32>
    %c2 = arith.constant 2 : index
    %c0_19 = arith.constant 0 : index
    %c0_20 = arith.constant 0 : index
    %33 = vector.load %arg9[%c2, %c0_19, %c0_20] : memref<8x8x128xf32, #tpu.memory_space<vmem>>, vector<1x8x128xf32>
    %34 = vector.shape_cast %33 : vector<1x8x128xf32> to vector<8x128xf32>
    %35 = vector.shape_cast %32 : vector<8x128xf32> to vector<1x8x128xf32>
    tpu.vector_store %arg9[%c2, %c0_19, %c0_20], %35 {strides = array<i32>} : memref<8x8x128xf32, #tpu.memory_space<vmem>>, vector<1x8x128xf32>,
    %36 = vector.extract_strided_slice %9 {offsets = [3, 0, 0], sizes = [1, 8, 128], strides = [1, 1, 1]} : vector<8x8x128xf32> to vector<1x8x128xf32>
    %37 = vector.shape_cast %36 : vector<1x8x128xf32> to vector<8x128xf32>
    %cst_21 = arith.constant dense<0.000000e+00> : vector<8x128xf32>
    %38 = tpu.matmul %32, %10, %cst_21 {dimension_numbers = #tpu.dot_dimension_numbers<[1], [0], [0], [1], [0, 0, 1, 1], [], []>} : vector<8x128xf32>, vector<128x128xf32>, vector<8x128xf32> -> vector<8x128xf32>
    %39 = arith.addf %37, %38 : vector<8x128xf32>
    %40 = math.tanh %39 : vector<8x128xf32>
    %c3 = arith.constant 3 : index
    %c0_22 = arith.constant 0 : index
    %c0_23 = arith.constant 0 : index
    %41 = vector.load %arg9[%c3, %c0_22, %c0_23] : memref<8x8x128xf32, #tpu.memory_space<vmem>>, vector<1x8x128xf32>
    %42 = vector.shape_cast %41 : vector<1x8x128xf32> to vector<8x128xf32>
    %43 = vector.shape_cast %40 : vector<8x128xf32> to vector<1x8x128xf32>
    tpu.vector_store %arg9[%c3, %c0_22, %c0_23], %43 {strides = array<i32>} : memref<8x8x128xf32, #tpu.memory_space<vmem>>, vector<1x8x128xf32>,
    %44 = vector.extract_strided_slice %9 {offsets = [4, 0, 0], sizes = [1, 8, 128], strides = [1, 1, 1]} : vector<8x8x128xf32> to vector<1x8x128xf32>
    %45 = vector.shape_cast %44 : vector<1x8x128xf32> to vector<8x128xf32>
    %cst_24 = arith.constant dense<0.000000e+00> : vector<8x128xf32>
    %46 = tpu.matmul %40, %10, %cst_24 {dimension_numbers = #tpu.dot_dimension_numbers<[1], [0], [0], [1], [0, 0, 1, 1], [], []>} : vector<8x128xf32>, vector<128x128xf32>, vector<8x128xf32> -> vector<8x128xf32>
    %47 = arith.addf %45, %46 : vector<8x128xf32>
    %48 = math.tanh %47 : vector<8x128xf32>
    %c4 = arith.constant 4 : index
    %c0_25 = arith.constant 0 : index
    %c0_26 = arith.constant 0 : index
    %49 = vector.load %arg9[%c4, %c0_25, %c0_26] : memref<8x8x128xf32, #tpu.memory_space<vmem>>, vector<1x8x128xf32>
    %50 = vector.shape_cast %49 : vector<1x8x128xf32> to vector<8x128xf32>
    %51 = vector.shape_cast %48 : vector<8x128xf32> to vector<1x8x128xf32>
    tpu.vector_store %arg9[%c4, %c0_25, %c0_26], %51 {strides = array<i32>} : memref<8x8x128xf32, #tpu.memory_space<vmem>>, vector<1x8x128xf32>,
    %52 = vector.extract_strided_slice %9 {offsets = [5, 0, 0], sizes = [1, 8, 128], strides = [1, 1, 1]} : vector<8x8x128xf32> to vector<1x8x128xf32>
    %53 = vector.shape_cast %52 : vector<1x8x128xf32> to vector<8x128xf32>
    %cst_27 = arith.constant dense<0.000000e+00> : vector<8x128xf32>
    %54 = tpu.matmul %48, %10, %cst_27 {dimension_numbers = #tpu.dot_dimension_numbers<[1], [0], [0], [1], [0, 0, 1, 1], [], []>} : vector<8x128xf32>, vector<128x128xf32>, vector<8x128xf32> -> vector<8x128xf32>
    %55 = arith.addf %53, %54 : vector<8x128xf32>
    %56 = math.tanh %55 : vector<8x128xf32>
    %c5 = arith.constant 5 : index
    %c0_28 = arith.constant 0 : index
    %c0_29 = arith.constant 0 : index
    %57 = vector.load %arg9[%c5, %c0_28, %c0_29] : memref<8x8x128xf32, #tpu.memory_space<vmem>>, vector<1x8x128xf32>
    %58 = vector.shape_cast %57 : vector<1x8x128xf32> to vector<8x128xf32>
    %59 = vector.shape_cast %56 : vector<8x128xf32> to vector<1x8x128xf32>
    tpu.vector_store %arg9[%c5, %c0_28, %c0_29], %59 {strides = array<i32>} : memref<8x8x128xf32, #tpu.memory_space<vmem>>, vector<1x8x128xf32>,
    %60 = vector.extract_strided_slice %9 {offsets = [6, 0, 0], sizes = [1, 8, 128], strides = [1, 1, 1]} : vector<8x8x128xf32> to vector<1x8x128xf32>
    %61 = vector.shape_cast %60 : vector<1x8x128xf32> to vector<8x128xf32>
    %cst_30 = arith.constant dense<0.000000e+00> : vector<8x128xf32>
    %62 = tpu.matmul %56, %10, %cst_30 {dimension_numbers = #tpu.dot_dimension_numbers<[1], [0], [0], [1], [0, 0, 1, 1], [], []>} : vector<8x128xf32>, vector<128x128xf32>, vector<8x128xf32> -> vector<8x128xf32>
    %63 = arith.addf %61, %62 : vector<8x128xf32>
    %64 = math.tanh %63 : vector<8x128xf32>
    %c6 = arith.constant 6 : index
    %c0_31 = arith.constant 0 : index
    %c0_32 = arith.constant 0 : index
    %65 = vector.load %arg9[%c6, %c0_31, %c0_32] : memref<8x8x128xf32, #tpu.memory_space<vmem>>, vector<1x8x128xf32>
    %66 = vector.shape_cast %65 : vector<1x8x128xf32> to vector<8x128xf32>
    %67 = vector.shape_cast %64 : vector<8x128xf32> to vector<1x8x128xf32>
    tpu.vector_store %arg9[%c6, %c0_31, %c0_32], %67 {strides = array<i32>} : memref<8x8x128xf32, #tpu.memory_space<vmem>>, vector<1x8x128xf32>,
    %68 = vector.extract_strided_slice %9 {offsets = [7, 0, 0], sizes = [1, 8, 128], strides = [1, 1, 1]} : vector<8x8x128xf32> to vector<1x8x128xf32>
    %69 = vector.shape_cast %68 : vector<1x8x128xf32> to vector<8x128xf32>
    %cst_33 = arith.constant dense<0.000000e+00> : vector<8x128xf32>
    %70 = tpu.matmul %64, %10, %cst_33 {dimension_numbers = #tpu.dot_dimension_numbers<[1], [0], [0], [1], [0, 0, 1, 1], [], []>} : vector<8x128xf32>, vector<128x128xf32>, vector<8x128xf32> -> vector<8x128xf32>
    %71 = arith.addf %69, %70 : vector<8x128xf32>
    %72 = math.tanh %71 : vector<8x128xf32>
    %c7 = arith.constant 7 : index
    %c0_34 = arith.constant 0 : index
    %c0_35 = arith.constant 0 : index
    %73 = vector.load %arg9[%c7, %c0_34, %c0_35] : memref<8x8x128xf32, #tpu.memory_space<vmem>>, vector<1x8x128xf32>
    %74 = vector.shape_cast %73 : vector<1x8x128xf32> to vector<8x128xf32>
    %75 = vector.shape_cast %72 : vector<8x128xf32> to vector<1x8x128xf32>
    tpu.vector_store %arg9[%c7, %c0_34, %c0_35], %75 {strides = array<i32>} : memref<8x8x128xf32, #tpu.memory_space<vmem>>, vector<1x8x128xf32>,
    %c0_36 = arith.constant 0 : index
    %c0_37 = arith.constant 0 : index
    %76 = vector.load %arg8[%c0_36, %c0_37] : memref<8x128xf32, #tpu.memory_space<vmem>>, vector<8x128xf32>
    tpu.vector_store %arg8[%c0_36, %c0_37], %72 {strides = array<i32>} : memref<8x128xf32, #tpu.memory_space<vmem>>, vector<8x128xf32>,
    %c0_38 = arith.constant 0 : index
    %c0_39 = arith.constant 0 : index
    %c0_40 = arith.constant 0 : index
    %77 = vector.load %arg9[%c0_38, %c0_39, %c0_40] : memref<8x8x128xf32, #tpu.memory_space<vmem>>, vector<8x8x128xf32>
    %c0_41 = arith.constant 0 : index
    %c0_42 = arith.constant 0 : index
    %78 = vector.load %arg5[%c0_41, %c0_42] : memref<128x128xf32, #tpu.memory_space<vmem>>, vector<128x128xf32>
    "tpu.trace_start"() <{level = 10 : i32, message = "tbh,hv->tbv"}> : () -> ()
    %cst_43 = arith.constant dense<0.000000e+00> : vector<8x8x128xf32>
    %79 = tpu.matmul %77, %78, %cst_43 {dimension_numbers = #tpu.dot_dimension_numbers<[2], [0], [0, 1], [1], [0, 0, 0, 1, 1, 1], [], []>} : vector<8x8x128xf32>, vector<128x128xf32>, vector<8x8x128xf32> -> vector<8x8x128xf32>
    "tpu.trace_stop"() : () -> ()
    %c0_44 = arith.constant 0 : index
    %c0_45 = arith.constant 0 : index
    %80 = vector.load %arg6[%c0_44, %c0_45] : memref<1x128xf32, #tpu.memory_space<vmem>>, vector<1x128xf32>
    %81 = vector.shape_cast %80 : vector<1x128xf32> to vector<1x1x128xf32>
    %82 = vector.broadcast %81 : vector<1x1x128xf32> to vector<8x8x128xf32>
    %83 = arith.addf %79, %82 : vector<8x8x128xf32>
    %c0_46 = arith.constant 0 : index
    %c0_47 = arith.constant 0 : index
    %c0_48 = arith.constant 0 : index
    %84 = vector.load %arg7[%c0_46, %c0_47, %c0_48] : memref<8x8x128xf32, #tpu.memory_space<vmem>>, vector<8x8x128xf32>
    tpu.vector_store %arg7[%c0_46, %c0_47, %c0_48], %83 {strides = array<i32>} : memref<8x8x128xf32, #tpu.memory_space<vmem>>, vector<8x8x128xf32>,
    return
  }
  func.func @transform_0(%arg0: i32) -> (i32, i32, i32) {
    %c0_i32 = arith.constant 0 : i32
    %c0_i32_0 = arith.constant 0 : i32
    %c0_i32_1 = arith.constant 0 : i32
    return %arg0, %c0_i32, %c0_i32_0 : i32, i32, i32
  }
  func.func @transform_1(%arg0: i32) -> (i32, i32) {
    %c0_i32 = arith.constant 0 : i32
    %c0_i32_0 = arith.constant 0 : i32
    %c0_i32_1 = arith.constant 0 : i32
    return %c0_i32, %c0_i32_0 : i32, i32
  }
  func.func @transform_2(%arg0: i32) -> (i32, i32) {
    %c0_i32 = arith.constant 0 : i32
    %c0_i32_0 = arith.constant 0 : i32
    %c0_i32_1 = arith.constant 0 : i32
    return %c0_i32, %c0_i32_0 : i32, i32
  }
  func.func @transform_3(%arg0: i32) -> (i32, i32) {
    %c0_i32 = arith.constant 0 : i32
    %c0_i32_0 = arith.constant 0 : i32
    %c0_i32_1 = arith.constant 0 : i32
    return %c0_i32, %c0_i32_0 : i32, i32
  }
  func.func @transform_4(%arg0: i32) -> (i32, i32) {
    %c0_i32 = arith.constant 0 : i32
    %c0_i32_0 = arith.constant 0 : i32
    %c0_i32_1 = arith.constant 0 : i32
    return %c0_i32, %c0_i32_0 : i32, i32
  }
  func.func @transform_5(%arg0: i32) -> (i32, i32) {
    %c0_i32 = arith.constant 0 : i32
    %c0_i32_0 = arith.constant 0 : i32
    %c0_i32_1 = arith.constant 0 : i32
    return %c0_i32, %c0_i32_0 : i32, i32
  }
  func.func @transform_6(%arg0: i32) -> (i32, i32, i32) {
    %c0_i32 = arith.constant 0 : i32
    %c0_i32_0 = arith.constant 0 : i32
    %c0_i32_1 = arith.constant 0 : i32
    return %arg0, %c0_i32, %c0_i32_0 : i32, i32, i32
  }
}

</mosaic_0001>

<bundles_post_ra>
// kernel: tpu_custom_call.1
= control target key start
LH: loop header
LB: loop body
LE: loop exit
PB: predicated region body
PF: predicated region fallthrough
CT: control target
= control target key end

     0   :  { %11 = vsyncpa [#allocation5], 0  ;;  %s2091_s0 = inlined_call_operand.hbm [shape: f32[8,8,16], index: 0, kind: input, shape index: {}]   ;;  %s2092_s1 = inlined_call_operand.hbm [shape: f32[16,128], index: 1, kind: input, shape index: {}]   ;;  %s2093_s2 = inlined_call_operand.hbm [shape: f32[128,128], index: 2, kind: input, shape index: {}]   ;;  %s2094_s3 = inlined_call_operand.vmem [shape: f32[1,128], index: 3, kind: input, shape index: {}]   ;;  %s2095_s4 = inlined_call_operand.hbm [shape: f32[128,128], index: 4, kind: input, shape index: {}]   ;;  %s2096_s5 = inlined_call_operand.vmem [shape: f32[1,128], index: 5, kind: input, shape index: {}]   ;;  %s2097_s6 = inlined_call_operand.hbm [shape: f32[8,8,128], index: 6, kind: output, shape index: {}]  }
   0x1   :  { %12 = vsyncpa [#allocation8], 0 }
   0x2   :  { %13 = vsyncpa [#allocation11], 0 }
   0x3   :  { %14 = vsyncpa [#allocation6], 0  ;;  %s1656_s21 = smov [#allocation7]   ;;  %s1657_s23 = smov [#allocation4]  }
   0x4   :  { %s32_s22 = sshll.u32 %s1656_s21, 4  ;;  %s20_s24 = sshll.u32 %s1657_s23, 4  ;;  %s33_s22 = int_to_ptr.vmem [resolvable:$true] %s32_s22  ;;  %s21_s24 = int_to_ptr.vmem [resolvable:$true] %s20_s24 }
   0x5   :  { %s1556_s25 = scalar_lea.vmem %s33_s22, 256  ;;  %p1561_p1 = scmp.lt.s32.totalorder %s33_s22, %s33_s22 }
   0x6   :  { %p1557_p0 = scmp.ne.s32.totalorder %s33_s22, %s1556_s25  ;;  %p1562_p2 = scmp.lt.s32.totalorder %s1556_s25, %s1556_s25 }
   0x8   :  { %p1563_p3 = por %p1562_p2, %p1561_p1 }
   0xa   :  { %p1564_p4 = pnand %p1563_p3, %p1557_p0 }
   0xc   :  { %1567 = shalt.err (!%p1564_p4)
}
   0xd   :  { %s1658_s26 = smov 128   ;;  %s1659_s27 = smov 8  }
   0xe   :  { %38 = dma.hbm_to_vmem [thread:$0]  %s2092_s1, 256, %s33_s22, [#allocation8], %s1658_s26, %s1658_s26, %s1659_s27  }
   0xf   :  { %s1576_s30 = scalar_lea.vmem %s21_s24, 1024  ;;  %p1581_p6 = scmp.lt.s32.totalorder %s21_s24, %s21_s24 }
  0x10   :  { %p1577_p5 = scmp.ne.s32.totalorder %s21_s24, %s1576_s30  ;;  %p1582_p7 = scmp.lt.s32.totalorder %s1576_s30, %s1576_s30 }
  0x12   :  { %p1583_p8 = por %p1582_p7, %p1581_p6 }
  0x14   :  { %p1584_p9 = pnand %p1583_p8, %p1577_p5 }
  0x16   :  { %1587 = shalt.err (!%p1584_p9)
}
  0x17   :  { %26 = dma.hbm_to_vmem [thread:$0]  %s2091_s0, 1024, %s21_s24, [#allocation5], %s1658_s26, %s1658_s26, %s1659_s27  }
  0x18   :  { %s1660_s9 = smov [#allocation9]   ;;  %s1661_s11 = smov [#allocation10]  }
  0x19   :  { %s44_s10 = sshll.u32 %s1660_s9, 4  ;;  %s58_s12 = sshll.u32 %s1661_s11, 4  ;;  %s45_s10 = int_to_ptr.vmem [resolvable:$true] %s44_s10  ;;  %s59_s12 = int_to_ptr.vmem [resolvable:$true] %s58_s12 }
  0x1a   :  { %s1596_s1 = scalar_lea.vmem %s45_s10, 2048  ;;  %p1601_p11 = scmp.lt.s32.totalorder %s45_s10, %s45_s10 }
  0x1b   :  { %p1597_p10 = scmp.ne.s32.totalorder %s45_s10, %s1596_s1  ;;  %p1602_p12 = scmp.lt.s32.totalorder %s1596_s1, %s1596_s1 }
  0x1d   :  { %p1603_p13 = por %p1602_p12, %p1601_p11 }
  0x1f   :  { %p1604_p0 = pnand %p1603_p13, %p1597_p10 }
  0x21   :  { %1607 = shalt.err (!%p1604_p0)
}
  0x22   :  { %50 = dma.hbm_to_vmem [thread:$0]  %s2093_s2, 2048, %s45_s10, [#allocation8], %s1658_s26, %s1658_s26, %s1659_s27  }
  0x23   :  { %s1616_s0 = scalar_lea.vmem %s59_s12, 2048  ;;  %p1621_p2 = scmp.lt.s32.totalorder %s59_s12, %s59_s12 }
  0x24   :  { %p1617_p1 = scmp.ne.s32.totalorder %s59_s12, %s1616_s0  ;;  %p1622_p3 = scmp.lt.s32.totalorder %s1616_s0, %s1616_s0 }
  0x26   :  { %p1623_p4 = por %p1622_p3, %p1621_p2 }
  0x28   :  { %p1624_p5 = pnand %p1623_p4, %p1617_p1 }
  0x2a   :  { %1627 = shalt.err (!%p1624_p5)
}
  0x2b   :  { %64 = dma.hbm_to_vmem [thread:$0]  %s2095_s4, 2048, %s59_s12, [#allocation11], %s1658_s26, %s1658_s26, %s1659_s27  }
  0x2c   :  { %1648 = dma.done.wait [#allocation5], 1024  }
  0x2d   :  { %1649 = vsyncadd [#allocation5], 4294966272 }
  0x2e   :  { %1650 = dma.done.wait [#allocation8], 2304  }
  0x2f   :  { %1651 = vsyncadd [#allocation8], 4294964992 }
  0x30   :  { %1652 = dma.done.wait [#allocation11], 2048  }
  0x31   :  { %1653 = vsyncadd [#allocation11], 4294965248  ;;  %v1662_v0 = vmov 0.0   ;;  %vm1663_vm0 = vmmov 0   ;;  %v1727_v1 = vld [vmem:[#allocation9 + $0x78] sm:$0xff]  ;;  %v1729_v2 = vld [vmem:[#allocation9 + $0x70] sm:$0xff] }
  0x32   :  { %1199 = vmatprep.subr.mxu0 %v1662_v0  ;;  %1231 = vmatprep.mubr.msk.f32.mxu0 %vm1663_vm0, %v1662_v0  ;;  %v1733_v3 = vld [vmem:[#allocation9 + $0x68] sm:$0xff]  ;;  %v93_v4 = vld [vmem:[#allocation7 + $0x8] sm:$0xff]  ;;  %v1737_v5 = vld [vmem:[#allocation9 + $0x60] sm:$0xff]  ;;  %vm101_vm1 = vcmask 130048  }
  0x33   :  { %1200 = vmatpush3.msra.mxu0 %v1727_v1  ;;  %1183 = vmatprep.subr.mxu1 %v93_v4  ;;  %v92_v6 = vld [vmem:[#allocation7] sm:$0xff]  ;;  %v1741_v8 = vld [vmem:[#allocation9 + $0x58] sm:$0xff]  ;;  %v1751_v11 = vld [vmem:[#allocation9 + $0x48] sm:$0xff] }
  0x34   :  { %1201 = vmatprep.subr.mxu0 %v1662_v0  ;;  %1184 = vmatpush3.msra.mxu1 %v93_v4  ;;  %v84_v7 = vld [vmem:[#allocation4] sm:$0xff]  ;;  %v85_v9 = vld [vmem:[#allocation4 + $0x8] sm:$0xff]  ;;  %v1757_v12 = vld [vmem:[#allocation9 + $0x40] sm:$0xff] }
  0x35   :  { %1202 = vmatpush3.msra.mxu0 %v1729_v2  ;;  %1185 = vmatprep.subr.mxu1 %v92_v6  ;;  %v1745_v10 = vld [vmem:[#allocation9 + $0x50] sm:$0xff]  ;;  %v1763_v13 = vld [vmem:[#allocation9 + $0x38] sm:$0xff]  ;;  %v1775_v15 = vld [vmem:[#allocation9 + $0x28] sm:$0xff] }
  0x36   :  { %1203 = vmatprep.subr.mxu0 %v1662_v0  ;;  %1186 = vmatpush3.msra.mxu1 %v92_v6  ;;  %v1769_v14 = vld [vmem:[#allocation9 + $0x30] sm:$0xff]  ;;  %v1781_v16 = vld [vmem:[#allocation9 + $0x20] sm:$0xff]  ;;  %v1787_v17 = vld [vmem:[#allocation9 + $0x18] sm:$0xff] }
  0x37   :  { %1204 = vmatpush3.msra.mxu0 %v1733_v3  ;;  %1187 = vmatprep.mubr.msk.f32.mxu1 %vm101_vm1, %v84_v7  ;;  %v1793_v18 = vld [vmem:[#allocation9 + $0x10] sm:$0xff]  ;;  %v1799_v19 = vld [vmem:[#allocation9 + $0x8] sm:$0xff]  ;;  %v1805_v20 = vld [vmem:[#allocation9] sm:$0xff] }
  0x38   :  { %1205 = vmatprep.subr.mxu0 %v1662_v0  ;;  %1188 = vmatmul.mubr.msk.f32.vlgmr.msra.gmra.mxu1 %vm101_vm1, %v85_v9  ;;  %v1864_v22 = vld [vmem:[%s2094_s3] ss:$0 sm:$0xff]  ;;  %v86_v29 = vld [vmem:[#allocation4 + $0x10] sm:$0xff]  ;;  %v87_v30 = vld [vmem:[#allocation4 + $0x18] sm:$0xff] }
  0x39   :  { %1206 = vmatpush3.msra.mxu0 %v1737_v5  ;;  %1269 = vmatprep.subr.mxu1 %v1662_v0  ;;  %v88_v31 = vld [vmem:[#allocation4 + $0x20] sm:$0xff]  ;;  %v89_v32 = vld [vmem:[#allocation4 + $0x28] sm:$0xff]  ;;  %v90_v33 = vld [vmem:[#allocation4 + $0x30] sm:$0xff] }
  0x3a   :  { %1207 = vmatprep.subr.mxu0 %v1662_v0  ;;  %1270 = vmatpush3.msra.mxu1 %v1727_v1  ;;  %v91_v34 = vld [vmem:[#allocation4 + $0x38] sm:$0xff]  ;;  %v863_v61 = vld [vmem:[#allocation10 + $0x78] sm:$0xff]  ;;  %v862_v4 = vld [vmem:[#allocation10 + $0x70] sm:$0xff] }
  0x3b   :  { %1208 = vmatpush3.msra.mxu0 %v1741_v8  ;;  %1271 = vmatprep.subr.mxu1 %v1662_v0  ;;  %v859_v6 = vld [vmem:[#allocation10 + $0x58] sm:$0xff]  ;;  %v858_v7 = vld [vmem:[#allocation10 + $0x50] sm:$0xff]  ;;  %v856_v9 = vld [vmem:[#allocation10 + $0x40] sm:$0xff] }
  0x3c   :  { %1209 = vmatprep.subr.mxu0 %v1662_v0  ;;  %1272 = vmatpush3.msra.mxu1 %v1729_v2 }
  0x3d   :  { %1210 = vmatpush3.msra.mxu0 %v1745_v10  ;;  %1273 = vmatprep.subr.mxu1 %v1662_v0 }
  0x3e   :  { %1211 = vmatprep.subr.mxu0 %v1662_v0  ;;  %1274 = vmatpush3.msra.mxu1 %v1733_v3 }
  0x3f   :  { %1212 = vmatpush3.msra.mxu0 %v1751_v11  ;;  %1275 = vmatprep.subr.mxu1 %v1662_v0 }
  0x40   :  { %1213 = vmatprep.subr.mxu0 %v1662_v0  ;;  %1276 = vmatpush3.msra.mxu1 %v1737_v5 }
  0x41   :  { %1214 = vmatpush3.msra.mxu0 %v1757_v12  ;;  %1277 = vmatprep.subr.mxu1 %v1662_v0 }
  0x42   :  { %1215 = vmatprep.subr.mxu0 %v1662_v0  ;;  %1278 = vmatpush3.msra.mxu1 %v1741_v8 }
  0x43   :  { %1216 = vmatpush3.msra.mxu0 %v1763_v13  ;;  %1279 = vmatprep.subr.mxu1 %v1662_v0 }
  0x44   :  { %1217 = vmatprep.subr.mxu0 %v1662_v0  ;;  %1280 = vmatpush3.msra.mxu1 %v1745_v10 }
  0x45   :  { %1218 = vmatpush3.msra.mxu0 %v1769_v14  ;;  %1281 = vmatprep.subr.mxu1 %v1662_v0 }
  0x46   :  { %1219 = vmatprep.subr.mxu0 %v1662_v0  ;;  %1282 = vmatpush3.msra.mxu1 %v1751_v11 }
  0x47   :  { %1220 = vmatpush3.msra.mxu0 %v1775_v15  ;;  %1283 = vmatprep.subr.mxu1 %v1662_v0 }
  0x48   :  { %1221 = vmatprep.subr.mxu0 %v1662_v0  ;;  %1284 = vmatpush3.msra.mxu1 %v1757_v12 }
  0x49   :  { %1222 = vmatpush3.msra.mxu0 %v1781_v16  ;;  %1285 = vmatprep.subr.mxu1 %v1662_v0 }
  0x4a   :  { %1223 = vmatprep.subr.mxu0 %v1662_v0  ;;  %1286 = vmatpush3.msra.mxu1 %v1763_v13 }
  0x4b   :  { %1224 = vmatpush3.msra.mxu0 %v1787_v17  ;;  %1287 = vmatprep.subr.mxu1 %v1662_v0 }
  0x4c   :  { %1225 = vmatprep.subr.mxu0 %v1662_v0  ;;  %1288 = vmatpush3.msra.mxu1 %v1769_v14 }
  0x4d   :  { %1226 = vmatpush3.msra.mxu0 %v1793_v18  ;;  %1289 = vmatprep.subr.mxu1 %v1662_v0 }
  0x4e   :  { %1227 = vmatprep.subr.mxu0 %v1662_v0  ;;  %1290 = vmatpush3.msra.mxu1 %v1775_v15 }
  0x4f   :  { %1228 = vmatpush3.msra.mxu0 %v1799_v19  ;;  %1291 = vmatprep.subr.mxu1 %v1662_v0 }
  0x50   :  { %1229 = vmatprep.subr.mxu0 %v1662_v0  ;;  %1292 = vmatpush3.msra.mxu1 %v1781_v16 }
  0x51   :  { %1230 = vmatpush3.msra.mxu0 %v1805_v20  ;;  %1293 = vmatprep.subr.mxu1 %v1662_v0 }
  0x52   :  { %1232 = vmatmul.mubr.f32.vlgmr.msra.gmra.mxu0 %v1662_v0  ;;  %1234 = vmatprep.subr.mxu0 %v1662_v0 }
  0x53   :  { %1235 = vmatpush3.msra.mxu0 %v1727_v1  ;;  %1266 = vmatprep.mubr.msk.f32.mxu0 %vm1663_vm0, %v1662_v0 }
  0x54   :  { %1236 = vmatprep.subr.mxu0 %v1662_v0  ;;  %1294 = vmatpush3.msra.mxu1 %v1787_v17 }
  0x55   :  { %1237 = vmatpush3.msra.mxu0 %v1729_v2  ;;  %1295 = vmatprep.subr.mxu1 %v1662_v0 }
  0x56   :  { %1238 = vmatprep.subr.mxu0 %v1662_v0  ;;  %1296 = vmatpush3.msra.mxu1 %v1793_v18 }
  0x57   :  { %1239 = vmatpush3.msra.mxu0 %v1733_v3  ;;  %1297 = vmatprep.subr.mxu1 %v1662_v0 }
  0x58   :  { %1240 = vmatprep.subr.mxu0 %v1662_v0  ;;  %1298 = vmatpush3.msra.mxu1 %v1799_v19 }
  0x59   :  { %1241 = vmatpush3.msra.mxu0 %v1737_v5  ;;  %1299 = vmatprep.subr.mxu1 %v1662_v0 }
  0x5a   :  { %1242 = vmatprep.subr.mxu0 %v1662_v0  ;;  %1300 = vmatpush3.msra.mxu1 %v1805_v20 }
  0x5b   :  { %1243 = vmatpush3.msra.mxu0 %v1741_v8  ;;  %1339 = vmatprep.subr.mxu1 %v1662_v0 }
  0x5c   :  { %1244 = vmatprep.subr.mxu0 %v1662_v0  ;;  %1190 = vmatprep.mubr.msk.f32.mxu1 %vm101_vm1, %v86_v29 }
  0x5d   :  { %1245 = vmatpush3.msra.mxu0 %v1745_v10  ;;  %1191 = vmatmul.mubr.msk.f32.gmra.mxu1 %vm101_vm1, %v87_v30 }
  0x5e   :  { %1246 = vmatprep.subr.mxu0 %v1662_v0  ;;  %1193 = vmatprep.mubr.msk.f32.mxu1 %vm101_vm1, %v88_v31 }
  0x5f   :  { %1247 = vmatpush3.msra.mxu0 %v1751_v11 }
  0x60   :  { %1248 = vmatprep.subr.mxu0 %v1662_v0 }
  0x61   :  { %1249 = vmatpush3.msra.mxu0 %v1757_v12  ;;  %1194 = vmatmul.mubr.msk.f32.gmra.mxu1 %vm101_vm1, %v89_v32 }
  0x62   :  { %1250 = vmatprep.subr.mxu0 %v1662_v0  ;;  %1196 = vmatprep.mubr.msk.f32.mxu1 %vm101_vm1, %v90_v33 }
  0x63   :  { %1251 = vmatpush3.msra.mxu0 %v1763_v13 }
  0x64   :  { %1252 = vmatprep.subr.mxu0 %v1662_v0 }
  0x65   :  { %1253 = vmatpush3.msra.mxu0 %v1769_v14  ;;  %1197 = vmatmul.mubr.msk.f32.gmra.mxu1 %vm101_vm1, %v91_v34 }
  0x66   :  { %1254 = vmatprep.subr.mxu0 %v1662_v0  ;;  %1301 = vmatprep.mubr.msk.f32.mxu1 %vm1663_vm0, %v1662_v0 }
  0x67   :  { %1255 = vmatpush3.msra.mxu0 %v1775_v15 }
  0x68   :  { %1256 = vmatprep.subr.mxu0 %v1662_v0 }
  0x69   :  { %1257 = vmatpush3.msra.mxu0 %v1781_v16 }
  0x6a   :  { %1258 = vmatprep.subr.mxu0 %v1662_v0 }
  0x6b   :  { %1259 = vmatpush3.msra.mxu0 %v1787_v17 }
  0x6c   :  { %1260 = vmatprep.subr.mxu0 %v1662_v0 }
  0x6d   :  { %1261 = vmatpush3.msra.mxu0 %v1793_v18 }
  0x6e   :  { %1262 = vmatprep.subr.mxu0 %v1662_v0 }
  0x6f   :  { %1263 = vmatpush3.msra.mxu0 %v1799_v19 }
  0x70   :  { %1264 = vmatprep.subr.mxu0 %v1662_v0 }
  0x71   :  { %1265 = vmatpush3.msra.mxu0 %v1805_v20 }
  0x72   :  { %1304 = vmatprep.subr.mxu0 %v1662_v0 }
  0xf8   :  { %v1189_v21 = vpop.f32.mrf.mxu1 }
  0xf9   :  { %v198_v35 = vadd.f32 %v1189_v21, %v1864_v22 }
  0xfa   :  { %v192_v23 = vpop.f32.mrf.mxu1 }
  0xfb   :  { %v193_v24 = vadd.f32 %v1864_v22, %v192_v23 }
 0x112   :  { %v314_v25 = vpop.f32.mrf.mxu0 }
 0x113   :  { %v318_v26 = vadd.f32 %v314_v25, %v193_v24  ;;  %v1012_v24 = vld [vmem:[%s2096_s5] ss:$0 sm:$0xff]  ;;  %s1664_s5 = smov [#allocation12]  }
 0x114   :  { %v1233_v27 = vpop.f32.mrf.mxu0  ;;  %s989_s18 = sshll.u32 %s1664_s5, 4  ;;  %s990_s18 = int_to_ptr.vmem [resolvable:$true] %s989_s18 }
 0x115   :  { %1532 = vtanh.f32 %v318_v26  ;;  %s1628_s19 = scalar_lea.vmem %s990_s18, 1024  ;;  %p1633_p7 = scmp.lt.s32.totalorder %s990_s18, %s990_s18 }
 0x116   :  { %p1629_p6 = scmp.ne.s32.totalorder %s990_s18, %s1628_s19  ;;  %p1634_p8 = scmp.lt.s32.totalorder %s1628_s19, %s1628_s19 }
 0x118   :  { %p1635_p9 = por %p1634_p8, %p1633_p7 }
 0x11a   :  { %p1636_p10 = pnand %p1635_p9, %p1629_p6 }
 0x11d   :  { %v1192_v40 = vpop.f32.mrf.mxu1 }
 0x11e   :  { %v208_v51 = vadd.f32 %v1192_v40, %v1864_v22 }
 0x11f   :  { %v202_v41 = vpop.f32.mrf.mxu1 }
 0x120   :  { %v203_v46 = vadd.f32 %v1864_v22, %v202_v41 }
 0x121   :  { %v1950_v42 = vpop.f32.mrf.mxu1 }
 0x122   :  { %v1867_v28 = vpop.eup %1532  ;;  %v218_v62 = vadd.f32 %v1950_v42, %v1864_v22 }
 0x123   :  { %1267 = vmatmul.mubr.f32.vlgmr.msra.gmra.mxu0 %v1867_v28  ;;  %v1952_v43 = vpop.f32.mrf.mxu1 }
 0x124   :  { %1305 = vmatpush3.msra.mxu0 %v1727_v1  ;;  %1336 = vmatprep.mubr.msk.f32.mxu0 %vm1663_vm0, %v1662_v0  ;;  %v213_v56 = vadd.f32 %v1864_v22, %v1952_v43 }
 0x125   :  { %1306 = vmatprep.subr.mxu0 %v1662_v0  ;;  %v1954_v44 = vpop.f32.mrf.mxu1 }
 0x126   :  { %1307 = vmatpush3.msra.mxu0 %v1729_v2 }
 0x127   :  { %1308 = vmatprep.subr.mxu0 %v1662_v0  ;;  %v1956_v45 = vpop.f32.mrf.mxu1 }
 0x128   :  { %1309 = vmatpush3.msra.mxu0 %v1733_v3 }
 0x129   :  { %1310 = vmatprep.subr.mxu0 %v1662_v0 }
 0x12a   :  { %1311 = vmatpush3.msra.mxu0 %v1737_v5 }
 0x12b   :  { %1312 = vmatprep.subr.mxu0 %v1662_v0 }
 0x12c   :  { %1313 = vmatpush3.msra.mxu0 %v1741_v8 }
 0x12d   :  { %1314 = vmatprep.subr.mxu0 %v1662_v0 }
 0x12e   :  { %1315 = vmatpush3.msra.mxu0 %v1745_v10 }
 0x12f   :  { %1316 = vmatprep.subr.mxu0 %v1662_v0 }
 0x130   :  { %1317 = vmatpush3.msra.mxu0 %v1751_v11 }
 0x131   :  { %1318 = vmatprep.subr.mxu0 %v1662_v0 }
 0x132   :  { %1319 = vmatpush3.msra.mxu0 %v1757_v12 }
 0x133   :  { %1320 = vmatprep.subr.mxu0 %v1662_v0 }
 0x134   :  { %1321 = vmatpush3.msra.mxu0 %v1763_v13 }
 0x135   :  { %1322 = vmatprep.subr.mxu0 %v1662_v0 }
 0x136   :  { %1323 = vmatpush3.msra.mxu0 %v1769_v14 }
 0x137   :  { %1324 = vmatprep.subr.mxu0 %v1662_v0 }
 0x138   :  { %1325 = vmatpush3.msra.mxu0 %v1775_v15 }
 0x139   :  { %1326 = vmatprep.subr.mxu0 %v1662_v0 }
 0x13a   :  { %1327 = vmatpush3.msra.mxu0 %v1781_v16 }
 0x13b   :  { %1328 = vmatprep.subr.mxu0 %v1662_v0 }
 0x13c   :  { %1329 = vmatpush3.msra.mxu0 %v1787_v17 }
 0x13d   :  { %1330 = vmatprep.subr.mxu0 %v1662_v0 }
 0x13e   :  { %1331 = vmatpush3.msra.mxu0 %v1793_v18 }
 0x13f   :  { %1332 = vmatprep.subr.mxu0 %v1662_v0 }
 0x140   :  { %1333 = vmatpush3.msra.mxu0 %v1799_v19 }
 0x141   :  { %1334 = vmatprep.subr.mxu0 %v1662_v0 }
 0x142   :  { %1335 = vmatpush3.msra.mxu0 %v1805_v20 }
 0x143   :  { %1374 = vmatprep.subr.mxu0 %v1662_v0 }
 0x1e3   :  { %v387_v36 = vpop.f32.mrf.mxu0 }
 0x1e4   :  { %v391_v37 = vadd.f32 %v387_v36, %v198_v35 }
 0x1e5   :  { %v1268_v38 = vpop.f32.mrf.mxu0 }
 0x1e6   :  { %1534 = vtanh.f32 %v391_v37  ;;  %v228_v37 = vadd.f32 %v1954_v44, %v1864_v22 }
 0x1f3   :  { %v1913_v39 = vpop.eup %1534 }
 0x1f4   :  { %1302 = vmatmul.mubr.f32.vlgmr.msra.gmra.mxu1 %v1913_v39 }
 0x1f5   :  { %1340 = vmatpush3.msra.mxu1 %v1727_v1  ;;  %1371 = vmatprep.mubr.msk.f32.mxu1 %vm1663_vm0, %v1662_v0 }
 0x1f6   :  { %1341 = vmatprep.subr.mxu1 %v1662_v0 }
 0x1f7   :  { %1342 = vmatpush3.msra.mxu1 %v1729_v2 }
 0x1f8   :  { %1343 = vmatprep.subr.mxu1 %v1662_v0 }
 0x1f9   :  { %1344 = vmatpush3.msra.mxu1 %v1733_v3 }
 0x1fa   :  { %1345 = vmatprep.subr.mxu1 %v1662_v0 }
 0x1fb   :  { %1346 = vmatpush3.msra.mxu1 %v1737_v5 }
 0x1fc   :  { %1347 = vmatprep.subr.mxu1 %v1662_v0 }
 0x1fd   :  { %1348 = vmatpush3.msra.mxu1 %v1741_v8 }
 0x1fe   :  { %1349 = vmatprep.subr.mxu1 %v1662_v0 }
 0x1ff   :  { %1350 = vmatpush3.msra.mxu1 %v1745_v10 }
 0x200   :  { %1351 = vmatprep.subr.mxu1 %v1662_v0 }
 0x201   :  { %1352 = vmatpush3.msra.mxu1 %v1751_v11 }
 0x202   :  { %1353 = vmatprep.subr.mxu1 %v1662_v0 }
 0x203   :  { %1354 = vmatpush3.msra.mxu1 %v1757_v12 }
 0x204   :  { %1355 = vmatprep.subr.mxu1 %v1662_v0 }
 0x205   :  { %1356 = vmatpush3.msra.mxu1 %v1763_v13 }
 0x206   :  { %1357 = vmatprep.subr.mxu1 %v1662_v0 }
 0x207   :  { %1358 = vmatpush3.msra.mxu1 %v1769_v14 }
 0x208   :  { %1359 = vmatprep.subr.mxu1 %v1662_v0 }
 0x209   :  { %1360 = vmatpush3.msra.mxu1 %v1775_v15 }
 0x20a   :  { %1361 = vmatprep.subr.mxu1 %v1662_v0 }
 0x20b   :  { %1362 = vmatpush3.msra.mxu1 %v1781_v16 }
 0x20c   :  { %1363 = vmatprep.subr.mxu1 %v1662_v0 }
 0x20d   :  { %1364 = vmatpush3.msra.mxu1 %v1787_v17 }
 0x20e   :  { %1365 = vmatprep.subr.mxu1 %v1662_v0 }
 0x20f   :  { %1366 = vmatpush3.msra.mxu1 %v1793_v18 }
 0x210   :  { %1367 = vmatprep.subr.mxu1 %v1662_v0 }
 0x211   :  { %1368 = vmatpush3.msra.mxu1 %v1799_v19 }
 0x212   :  { %1369 = vmatprep.subr.mxu1 %v1662_v0 }
 0x213   :  { %1370 = vmatpush3.msra.mxu1 %v1805_v20 }
 0x214   :  { %1409 = vmatprep.subr.mxu1 %v1662_v0 }
 0x2b4   :  { %v461_v47 = vpop.f32.mrf.mxu1 }
 0x2b5   :  { %v465_v48 = vadd.f32 %v461_v47, %v203_v46 }
 0x2b6   :  { %v1303_v49 = vpop.f32.mrf.mxu1 }
 0x2b7   :  { %1536 = vtanh.f32 %v465_v48 }
 0x2c4   :  { %v1959_v50 = vpop.eup %1536 }
 0x2c5   :  { %1337 = vmatmul.mubr.f32.vlgmr.msra.gmra.mxu0 %v1959_v50 }
 0x2c6   :  { %1375 = vmatpush3.msra.mxu0 %v1727_v1  ;;  %1406 = vmatprep.mubr.msk.f32.mxu0 %vm1663_vm0, %v1662_v0 }
 0x2c7   :  { %1376 = vmatprep.subr.mxu0 %v1662_v0 }
 0x2c8   :  { %1377 = vmatpush3.msra.mxu0 %v1729_v2 }
 0x2c9   :  { %1378 = vmatprep.subr.mxu0 %v1662_v0 }
 0x2ca   :  { %1379 = vmatpush3.msra.mxu0 %v1733_v3 }
 0x2cb   :  { %1380 = vmatprep.subr.mxu0 %v1662_v0 }
 0x2cc   :  { %1381 = vmatpush3.msra.mxu0 %v1737_v5 }
 0x2cd   :  { %1382 = vmatprep.subr.mxu0 %v1662_v0 }
 0x2ce   :  { %1383 = vmatpush3.msra.mxu0 %v1741_v8 }
 0x2cf   :  { %1384 = vmatprep.subr.mxu0 %v1662_v0 }
 0x2d0   :  { %1385 = vmatpush3.msra.mxu0 %v1745_v10 }
 0x2d1   :  { %1386 = vmatprep.subr.mxu0 %v1662_v0 }
 0x2d2   :  { %1387 = vmatpush3.msra.mxu0 %v1751_v11 }
 0x2d3   :  { %1388 = vmatprep.subr.mxu0 %v1662_v0 }
 0x2d4   :  { %1389 = vmatpush3.msra.mxu0 %v1757_v12 }
 0x2d5   :  { %1390 = vmatprep.subr.mxu0 %v1662_v0 }
 0x2d6   :  { %1391 = vmatpush3.msra.mxu0 %v1763_v13 }
 0x2d7   :  { %1392 = vmatprep.subr.mxu0 %v1662_v0 }
 0x2d8   :  { %1393 = vmatpush3.msra.mxu0 %v1769_v14 }
 0x2d9   :  { %1394 = vmatprep.subr.mxu0 %v1662_v0 }
 0x2da   :  { %1395 = vmatpush3.msra.mxu0 %v1775_v15 }
 0x2db   :  { %1396 = vmatprep.subr.mxu0 %v1662_v0 }
 0x2dc   :  { %1397 = vmatpush3.msra.mxu0 %v1781_v16 }
 0x2dd   :  { %1398 = vmatprep.subr.mxu0 %v1662_v0 }
 0x2de   :  { %1399 = vmatpush3.msra.mxu0 %v1787_v17 }
 0x2df   :  { %1400 = vmatprep.subr.mxu0 %v1662_v0 }
 0x2e0   :  { %1401 = vmatpush3.msra.mxu0 %v1793_v18 }
 0x2e1   :  { %1402 = vmatprep.subr.mxu0 %v1662_v0 }
 0x2e2   :  { %1403 = vmatpush3.msra.mxu0 %v1799_v19 }
 0x2e3   :  { %1404 = vmatprep.subr.mxu0 %v1662_v0 }
 0x2e4   :  { %1405 = vmatpush3.msra.mxu0 %v1805_v20 }
 0x2e5   :  { %1444 = vmatprep.subr.mxu0 %v1662_v0 }
 0x385   :  { %v535_v52 = vpop.f32.mrf.mxu0 }
 0x386   :  { %v539_v53 = vadd.f32 %v535_v52, %v208_v51 }
 0x387   :  { %v1338_v54 = vpop.f32.mrf.mxu0 }
 0x388   :  { %1538 = vtanh.f32 %v539_v53 }
 0x395   :  { %v1997_v55 = vpop.eup %1538 }
 0x396   :  { %1372 = vmatmul.mubr.f32.vlgmr.msra.gmra.mxu1 %v1997_v55 }
 0x397   :  { %1410 = vmatpush3.msra.mxu1 %v1727_v1  ;;  %1441 = vmatprep.mubr.msk.f32.mxu1 %vm1663_vm0, %v1662_v0 }
 0x398   :  { %1411 = vmatprep.subr.mxu1 %v1662_v0 }
 0x399   :  { %1412 = vmatpush3.msra.mxu1 %v1729_v2 }
 0x39a   :  { %1413 = vmatprep.subr.mxu1 %v1662_v0 }
 0x39b   :  { %1414 = vmatpush3.msra.mxu1 %v1733_v3 }
 0x39c   :  { %1415 = vmatprep.subr.mxu1 %v1662_v0 }
 0x39d   :  { %1416 = vmatpush3.msra.mxu1 %v1737_v5 }
 0x39e   :  { %1417 = vmatprep.subr.mxu1 %v1662_v0 }
 0x39f   :  { %1418 = vmatpush3.msra.mxu1 %v1741_v8 }
 0x3a0   :  { %1419 = vmatprep.subr.mxu1 %v1662_v0 }
 0x3a1   :  { %1420 = vmatpush3.msra.mxu1 %v1745_v10 }
 0x3a2   :  { %1421 = vmatprep.subr.mxu1 %v1662_v0 }
 0x3a3   :  { %1422 = vmatpush3.msra.mxu1 %v1751_v11 }
 0x3a4   :  { %1423 = vmatprep.subr.mxu1 %v1662_v0 }
 0x3a5   :  { %1424 = vmatpush3.msra.mxu1 %v1757_v12 }
 0x3a6   :  { %1425 = vmatprep.subr.mxu1 %v1662_v0 }
 0x3a7   :  { %1426 = vmatpush3.msra.mxu1 %v1763_v13 }
 0x3a8   :  { %1427 = vmatprep.subr.mxu1 %v1662_v0 }
 0x3a9   :  { %1428 = vmatpush3.msra.mxu1 %v1769_v14 }
 0x3aa   :  { %1429 = vmatprep.subr.mxu1 %v1662_v0 }
 0x3ab   :  { %1430 = vmatpush3.msra.mxu1 %v1775_v15 }
 0x3ac   :  { %1431 = vmatprep.subr.mxu1 %v1662_v0 }
 0x3ad   :  { %1432 = vmatpush3.msra.mxu1 %v1781_v16 }
 0x3ae   :  { %1433 = vmatprep.subr.mxu1 %v1662_v0 }
 0x3af   :  { %1434 = vmatpush3.msra.mxu1 %v1787_v17 }
 0x3b0   :  { %1435 = vmatprep.subr.mxu1 %v1662_v0 }
 0x3b1   :  { %1436 = vmatpush3.msra.mxu1 %v1793_v18 }
 0x3b2   :  { %1437 = vmatprep.subr.mxu1 %v1662_v0 }
 0x3b3   :  { %1438 = vmatpush3.msra.mxu1 %v1799_v19 }
 0x3b4   :  { %1439 = vmatprep.subr.mxu1 %v1662_v0 }
 0x3b5   :  { %1440 = vmatpush3.msra.mxu1 %v1805_v20 }
 0x3b6   :  { %1479 = vmatprep.subr.mxu1 %v863_v61 }
 0x456   :  { %v609_v57 = vpop.f32.mrf.mxu1 }
 0x457   :  { %v613_v58 = vadd.f32 %v609_v57, %v213_v56 }
 0x458   :  { %v1373_v59 = vpop.f32.mrf.mxu1 }
 0x459   :  { %1540 = vtanh.f32 %v613_v58 }
 0x466   :  { %v2035_v60 = vpop.eup %1540 }
 0x467   :  { %1407 = vmatmul.mubr.f32.vlgmr.msra.gmra.mxu0 %v2035_v60 }
 0x468   :  { %1445 = vmatpush3.msra.mxu0 %v1727_v1  ;;  %1476 = vmatprep.mubr.msk.f32.mxu0 %vm1663_vm0, %v1662_v0 }
 0x469   :  { %1446 = vmatprep.subr.mxu0 %v1662_v0 }
 0x46a   :  { %1447 = vmatpush3.msra.mxu0 %v1729_v2 }
 0x46b   :  { %1448 = vmatprep.subr.mxu0 %v1662_v0 }
 0x46c   :  { %1449 = vmatpush3.msra.mxu0 %v1733_v3 }
 0x46d   :  { %1450 = vmatprep.subr.mxu0 %v1662_v0 }
 0x46e   :  { %1451 = vmatpush3.msra.mxu0 %v1737_v5  ;;  %v861_v5 = vld [vmem:[#allocation10 + $0x68] sm:$0xff] }
 0x46f   :  { %1452 = vmatprep.subr.mxu0 %v1662_v0 }
 0x470   :  { %1453 = vmatpush3.msra.mxu0 %v1741_v8  ;;  %v857_v8 = vld [vmem:[#allocation10 + $0x48] sm:$0xff] }
 0x471   :  { %1454 = vmatprep.subr.mxu0 %v1662_v0 }
 0x472   :  { %1455 = vmatpush3.msra.mxu0 %v1745_v10  ;;  %v855_v10 = vld [vmem:[#allocation10 + $0x38] sm:$0xff] }
 0x473   :  { %1456 = vmatprep.subr.mxu0 %v1662_v0 }
 0x474   :  { %1457 = vmatpush3.msra.mxu0 %v1751_v11  ;;  %v854_v11 = vld [vmem:[#allocation10 + $0x30] sm:$0xff] }
 0x475   :  { %1458 = vmatprep.subr.mxu0 %v1662_v0 }
 0x476   :  { %1459 = vmatpush3.msra.mxu0 %v1757_v12  ;;  %v853_v12 = vld [vmem:[#allocation10 + $0x28] sm:$0xff] }
 0x477   :  { %1460 = vmatprep.subr.mxu0 %v1662_v0 }
 0x478   :  { %1461 = vmatpush3.msra.mxu0 %v1763_v13  ;;  %v852_v13 = vld [vmem:[#allocation10 + $0x20] sm:$0xff] }
 0x479   :  { %1462 = vmatprep.subr.mxu0 %v1662_v0 }
 0x47a   :  { %1463 = vmatpush3.msra.mxu0 %v1769_v14  ;;  %v851_v14 = vld [vmem:[#allocation10 + $0x18] sm:$0xff] }
 0x47b   :  { %1464 = vmatprep.subr.mxu0 %v1662_v0 }
 0x47c   :  { %1465 = vmatpush3.msra.mxu0 %v1775_v15  ;;  %v850_v15 = vld [vmem:[#allocation10 + $0x10] sm:$0xff] }
 0x47d   :  { %1466 = vmatprep.subr.mxu0 %v1662_v0 }
 0x47e   :  { %1467 = vmatpush3.msra.mxu0 %v1781_v16  ;;  %v849_v16 = vld [vmem:[#allocation10 + $0x8] sm:$0xff] }
 0x47f   :  { %1468 = vmatprep.subr.mxu0 %v1662_v0 }
 0x480   :  { %1469 = vmatpush3.msra.mxu0 %v1787_v17  ;;  %v848_v17 = vld [vmem:[#allocation10] sm:$0xff] }
 0x481   :  { %1470 = vmatprep.subr.mxu0 %v1662_v0 }
 0x482   :  { %1471 = vmatpush3.msra.mxu0 %v1793_v18  ;;  %v223_v18 = vadd.f32 %v1864_v22, %v1956_v45 }
 0x483   :  { %1472 = vmatprep.subr.mxu0 %v1662_v0 }
 0x484   :  { %1473 = vmatpush3.msra.mxu0 %v1799_v19 }
 0x485   :  { %1474 = vmatprep.subr.mxu0 %v1662_v0  ;;  %v860_v0 = vld [vmem:[#allocation10 + $0x60] sm:$0xff] }
 0x486   :  { %1475 = vmatpush3.msra.mxu0 %v1805_v20 }
 0x527   :  { %v683_v63 = vpop.f32.mrf.mxu0 }
 0x528   :  { %v687_v1 = vadd.f32 %v683_v63, %v218_v62 }
 0x529   :  { %v1408_v2 = vpop.f32.mrf.mxu0 }
 0x52a   :  { %1542 = vtanh.f32 %v687_v1 }
 0x537   :  { %v1543_v3 = vpop.eup %1542 }
 0x538   :  { %1442 = vmatmul.mubr.f32.vlgmr.msra.gmra.mxu1 %v1543_v3 }
 0x539   :  { %1480 = vmatpush3.msra.mxu1 %v863_v61  ;;  %1511 = vmatprep.mubr.f32.mxu1 %v1867_v28 }
 0x53a   :  { %1481 = vmatprep.subr.mxu1 %v862_v4 }
 0x53b   :  { %1482 = vmatpush3.msra.mxu1 %v862_v4 }
 0x53c   :  { %1483 = vmatprep.subr.mxu1 %v861_v5 }
 0x53d   :  { %1484 = vmatpush3.msra.mxu1 %v861_v5 }
 0x53e   :  { %1485 = vmatprep.subr.mxu1 %v860_v0 }
 0x53f   :  { %1486 = vmatpush3.msra.mxu1 %v860_v0 }
 0x540   :  { %1487 = vmatprep.subr.mxu1 %v859_v6 }
 0x541   :  { %1488 = vmatpush3.msra.mxu1 %v859_v6 }
 0x542   :  { %1489 = vmatprep.subr.mxu1 %v858_v7 }
 0x543   :  { %1490 = vmatpush3.msra.mxu1 %v858_v7 }
 0x544   :  { %1491 = vmatprep.subr.mxu1 %v857_v8 }
 0x545   :  { %1492 = vmatpush3.msra.mxu1 %v857_v8 }
 0x546   :  { %1493 = vmatprep.subr.mxu1 %v856_v9 }
 0x547   :  { %1494 = vmatpush3.msra.mxu1 %v856_v9 }
 0x548   :  { %1495 = vmatprep.subr.mxu1 %v855_v10 }
 0x549   :  { %1496 = vmatpush3.msra.mxu1 %v855_v10 }
 0x54a   :  { %1497 = vmatprep.subr.mxu1 %v854_v11 }
 0x54b   :  { %1498 = vmatpush3.msra.mxu1 %v854_v11 }
 0x54c   :  { %1499 = vmatprep.subr.mxu1 %v853_v12 }
 0x54d   :  { %1500 = vmatpush3.msra.mxu1 %v853_v12 }
 0x54e   :  { %1501 = vmatprep.subr.mxu1 %v852_v13 }
 0x54f   :  { %1502 = vmatpush3.msra.mxu1 %v852_v13 }
 0x550   :  { %1503 = vmatprep.subr.mxu1 %v851_v14 }
 0x551   :  { %1504 = vmatpush3.msra.mxu1 %v851_v14 }
 0x552   :  { %1505 = vmatprep.subr.mxu1 %v850_v15 }
 0x553   :  { %1506 = vmatpush3.msra.mxu1 %v850_v15 }
 0x554   :  { %1507 = vmatprep.subr.mxu1 %v849_v16 }
 0x555   :  { %1508 = vmatpush3.msra.mxu1 %v849_v16 }
 0x556   :  { %1509 = vmatprep.subr.mxu1 %v848_v17 }
 0x557   :  { %1510 = vmatpush3.msra.mxu1 %v848_v17 }
 0x558   :  { %1512 = vmatmul.mubr.f32.vlgmr.msra.gmra.mxu1 %v1913_v39 }
 0x559   :  { %1514 = vmatprep.mubr.f32.mxu1 %v1959_v50 }
 0x55c   :  { %1515 = vmatmul.mubr.f32.gmra.mxu1 %v1997_v55 }
 0x55d   :  { %1517 = vmatprep.mubr.f32.mxu1 %v2035_v60 }
 0x560   :  { %1518 = vmatmul.mubr.f32.gmra.mxu1 %v1543_v3 }
 0x5f8   :  { %v757_v19 = vpop.f32.mrf.mxu1 }
 0x5f9   :  { %v761_v20 = vadd.f32 %v757_v19, %v223_v18 }
 0x5fa   :  { %v1443_v21 = vpop.f32.mrf.mxu1 }
 0x5fb   :  { %1544 = vtanh.f32 %v761_v20 }
 0x608   :  { %v1545_v23 = vpop.eup %1544 }
 0x609   :  { %1477 = vmatmul.mubr.f32.vlgmr.msra.gmra.mxu0 %v1545_v23  ;;  %1520 = vmatprep.mubr.f32.mxu1 %v1545_v23 }
 0x618   :  { %v1513_v25 = vpop.f32.mrf.mxu1 }
 0x619   :  { %v943_v26 = vadd.f32 %v1513_v25, %v1012_v24 }
 0x61a   :  { %v937_v27 = vpop.f32.mrf.mxu1 }
 0x61b   :  { %977 = vst [vmem:[#allocation12 + $0x8] sm:$0xff] %v943_v26  ;;  %v938_v28 = vadd.f32 %v1012_v24, %v937_v27 }
 0x61c   :  { %v1516_v29 = vpop.f32.mrf.mxu1 }
 0x61d   :  { %976 = vst [vmem:[#allocation12] sm:$0xff] %v938_v28  ;;  %v953_v30 = vadd.f32 %v1516_v29, %v1012_v24 }
 0x61e   :  { %v947_v31 = vpop.f32.mrf.mxu1 }
 0x61f   :  { %979 = vst [vmem:[#allocation12 + $0x18] sm:$0xff] %v953_v30  ;;  %v948_v32 = vadd.f32 %v1012_v24, %v947_v31 }
 0x620   :  { %v1519_v33 = vpop.f32.mrf.mxu1 }
 0x621   :  { %978 = vst [vmem:[#allocation12 + $0x10] sm:$0xff] %v948_v32  ;;  %v963_v34 = vadd.f32 %v1519_v33, %v1012_v24 }
 0x622   :  { %v957_v35 = vpop.f32.mrf.mxu1 }
 0x623   :  { %981 = vst [vmem:[#allocation12 + $0x28] sm:$0xff] %v963_v34  ;;  %v958_v36 = vadd.f32 %v1012_v24, %v957_v35 }
 0x625   :  { %980 = vst [vmem:[#allocation12 + $0x20] sm:$0xff] %v958_v36 }
 0x6c9   :  { %v831_v38 = vpop.f32.mrf.mxu0 }
 0x6ca   :  { %v835_v39 = vadd.f32 %v831_v38, %v228_v37 }
 0x6cb   :  { %v1478_v40 = vpop.f32.mrf.mxu0 }
 0x6cc   :  { %1546 = vtanh.f32 %v835_v39 }
 0x6d9   :  { %v1547_v41 = vpop.eup %1546 }
 0x6da   :  { %1521 = vmatmul.mubr.f32.gmra.mxu1 %v1547_v41 }
 0x79a   :  { %v1522_v42 = vpop.f32.mrf.mxu1 }
 0x79b   :  { %v973_v43 = vadd.f32 %v1522_v42, %v1012_v24 }
 0x79c   :  { %v967_v45 = vpop.f32.mrf.mxu1 }
 0x79d   :  { %983 = vst [vmem:[#allocation12 + $0x38] sm:$0xff] %v973_v43  ;;  %v968_v46 = vadd.f32 %v1012_v24, %v967_v45 }
 0x79f   :  { %982 = vst [vmem:[#allocation12 + $0x30] sm:$0xff] %v968_v46 }
 0x7a0   :  { %1639 = shalt.err (!%p1636_p10)
}
 0x7a1   :  { %995 = dma.vmem_to_hbm [thread:$0]  %s990_s18, 1024, %s2097_s6, [#allocation6], %s1658_s26, %s1658_s26, %s1659_s27  }
 0x7a2   :  { %1654 = dma.done.wait [#allocation6], 1024  }
 0x7a3   :  { %1655 = vsyncadd [#allocation6], 4294966272 }
 0x7a4   :  { %999 = vsyncpa [#allocation5], 1 }
 0x7a5   :  { %1000 = vsyncpa [#allocation8], 1 }
 0x7a6   :  { %1001 = vsyncpa [#allocation11], 1 }
 0x7a7   :  { %1002 = vsyncpa [#allocation6], 1 }

</bundles_post_ra>
